<compile_context>
chip_gen: v7x
topology: tpu7x:2x2x1
jax: 0.10.0
libtpu: 0.0.40
codegen_flags: <defaults>
</compile_context>

<pallas_src>
import functools
import numpy as np
import jax
import jax.numpy as jnp
from jax.experimental import pallas as pl
from jax.experimental.pallas import tpu as pltpu


def _adaptive_avg_pool1d_matrix(in_len: int, out_len: int) -> np.ndarray:
    """P[j, i] such that (y @ P)[b, i] == F.adaptive_avg_pool1d(y, out_len)[b, i]."""
    P = np.zeros((in_len, out_len), dtype=np.float32)
    for i in range(out_len):
        s = (i * in_len) // out_len                 # floor
        e = -((-(i + 1) * in_len) // out_len)       # ceil
        P[s:e, i] = 1.0 / float(e - s)
    return P


def _pick_chunk(hwp: int) -> int:
    """Largest lane-chunk (multiple of 128) that divides the padded spatial dim."""
    for c in (2048, 1024, 512, 256, 128):
        if hwp % c == 0:
            return c
    return hwp


def frame_pooling_kernel(x_ref, w1c_ref, b1c_ref, w2_ref, b2c_ref, poolT_ref,
                         o_ref, *, hw: int):
    # x_ref / o_ref blocks: (1, C, HWp); weights are small, fully resident.
    _, C, HWp = x_ref.shape
    chunk = _pick_chunk(HWp)
    n_chunks = HWp // chunk

    # --- Global average pool over spatial dims (AdaptiveAvgPool2d(1)) ---
    # Stage 1: VPU partial sums over lane chunks (sliced from VMEM -> bounded
    # vreg pressure). Stage 2: one small cross-lane reduce on the (C, chunk)
    # accumulator. Padded lanes are zero, so dividing by the true hw is exact.
    acc = x_ref[0, :, 0:chunk]
    for j in range(1, n_chunks):
        acc = acc + x_ref[0, :, j * chunk:(j + 1) * chunk]
    y = jnp.sum(acc, axis=-1, keepdims=True) * (1.0 / hw)          # (C, 1)

    # --- SE-style MLP in column orientation (no intermediate transposes) ---
    # ZeroPad(C -> TC) + Linear(TC, L): zeros drop out, so W1 is pre-sliced to
    # its first C input columns -> (L, C) matvec.
    h = jnp.dot(w1c_ref[...], y, preferred_element_type=jnp.float32) + b1c_ref[...]
    h = jnp.maximum(h, 0.0)                                         # (L, 1)
    z = jnp.dot(w2_ref[...], h, preferred_element_type=jnp.float32) + b2c_ref[...]
    z = jax.nn.sigmoid(z)                                           # (TC, 1)
    # adaptive_avg_pool1d(TC -> C) as a matvec with the (C, TC) pooling matrix.
    scale = jnp.dot(poolT_ref[...], z, preferred_element_type=jnp.float32)  # (C, 1)

    # --- Channel-wise rescaling of the input, chunk by chunk (lane-dense) ---
    for j in range(n_chunks):
        sl = slice(j * chunk, (j + 1) * chunk)
        o_ref[0, :, sl] = x_ref[0, :, sl] * scale


def frame_pooling(x, w1, b1, w2, b2, *, target_channel: int):
    """x: (B, C, H, W) float32. Returns (B, C, H, W)."""
    B, C, H, W = x.shape
    assert target_channel - C > 0, "Input channels larger than specified"
    L = w1.shape[0]
    TC = target_channel
    HW = H * W
    HWp = ((HW + 127) // 128) * 128                   # lane-dense padding

    x3 = x.reshape(B, C, HW).astype(jnp.float32)
    if HWp != HW:
        x3 = jnp.pad(x3, ((0, 0), (0, 0), (0, HWp - HW)))

    # Column-oriented parameters (channels on sublanes).
    w1c = jnp.asarray(w1[:, :C], dtype=jnp.float32)                 # (L, C)
    b1c = jnp.asarray(b1, dtype=jnp.float32).reshape(L, 1)          # (L, 1)
    w2m = jnp.asarray(w2, dtype=jnp.float32)                        # (TC, L)
    b2c = jnp.asarray(b2, dtype=jnp.float32).reshape(TC, 1)         # (TC, 1)
    poolT = jnp.asarray(_adaptive_avg_pool1d_matrix(TC, C).T)       # (C, TC)

    # VMEM budget: 2x double-buffered (1, C, HWp) input + output slabs, small
    # weights, plus headroom. NOTE: for very large C*H*W (where a per-batch
    # slab no longer fits, esp. v7x's 64 MiB VMEM) an inner HW grid axis with
    # a two-pass reduce/scale would be needed.
    block_bytes = C * HWp * 4
    vmem_limit = int(min(100 * 1024 * 1024,
                         max(32 * 1024 * 1024, 4 * block_bytes + (4 << 20))))

    kernel = functools.partial(frame_pooling_kernel, hw=HW)

    out3 = pl.pallas_call(
        kernel,
        out_shape=jax.ShapeDtypeStruct((B, C, HWp), jnp.float32),
        grid=(B,),
        in_specs=[
            pl.BlockSpec((1, C, HWp), lambda b: (b, 0, 0)),   # x: one batch per step
            pl.BlockSpec((L, C), lambda b: (0, 0)),           # W1[:, :C], resident
            pl.BlockSpec((L, 1), lambda b: (0, 0)),           # b1
            pl.BlockSpec((TC, L), lambda b: (0, 0)),          # W2
            pl.BlockSpec((TC, 1), lambda b: (0, 0)),          # b2
            pl.BlockSpec((C, TC), lambda b: (0, 0)),          # pooling matrix^T
        ],
        out_specs=pl.BlockSpec((1, C, HWp), lambda b: (b, 0, 0)),
        compiler_params=pltpu.CompilerParams(
            dimension_semantics=("parallel",),
            vmem_limit_bytes=vmem_limit,
        ),
        input_output_aliases={0: 0},
        cost_estimate=pl.CostEstimate(
            flops=2 * B * C * HWp + 2 * B * (L * C + TC * L + C * TC),
            transcendentals=B * TC,
            bytes_accessed=2 * B * C * HWp * 4,
        ),
    )(x3, w1c, b1c, w2m, b2c, poolT)

    return out3[:, :, :HW].reshape(B, C, H, W)


def frame_pooling_reference(x, w1, b1, w2, b2, *, target_channel: int):
    """Pure-JAX reference mirroring the PyTorch forward."""
    B, C, H, W = x.shape
    y = jnp.mean(x, axis=(2, 3))                                      # (B, C)
    pad = jnp.zeros((B, target_channel - C), dtype=y.dtype)
    y = jnp.concatenate([y, pad], axis=1)                             # (B, TC)
    y = jnp.maximum(y @ w1.T + b1, 0.0)                               # (B, L)
    y = jax.nn.sigmoid(y @ w2.T + b2)                                 # (B, TC)
    P = jnp.asarray(_adaptive_avg_pool1d_matrix(target_channel, C))
    scale = y @ P                                                     # (B, C)
    return x * scale[:, :, None, None]


if __name__ == "__main__":
    # Small shapes consistent with the module's forward.
    B, C, H, W = 2, 4, 16, 16
    target_channel = 8      # must be > C (ChannelZeroPadding requirement)
    linear_dim = 32

    key = jax.random.PRNGKey(0)
    kx, k1, k2, k3, k4 = jax.random.split(key, 5)

    x = jax.random.normal(kx, (B, C, H, W), dtype=jnp.float32)

    # Deterministic parameter init (PyTorch-Linear-style uniform bounds).
    bound1 = 1.0 / np.sqrt(target_channel)
    w1 = jax.random.uniform(k1, (linear_dim, target_channel), jnp.float32, -bound1, bound1)
    b1 = jax.random.uniform(k2, (linear_dim,), jnp.float32, -bound1, bound1)
    bound2 = 1.0 / np.sqrt(linear_dim)
    w2 = jax.random.uniform(k3, (target_channel, linear_dim), jnp.float32, -bound2, bound2)
    b2 = jax.random.uniform(k4, (target_channel,), jnp.float32, -bound2, bound2)

    run = jax.jit(functools.partial(frame_pooling, target_channel=target_channel))
    out = run(x, w1, b1, w2, b2)
    out = jax.block_until_ready(out)

    ref = frame_pooling_reference(x, w1, b1, w2, b2, target_channel=target_channel)
    np.testing.assert_allclose(np.asarray(out), np.asarray(ref), atol=1e-5, rtol=1e-5)

    print("KERNEL_OK")
</pallas_src>

<mosaic_0001>
module attributes {stable_mosaic.version = 11 : i64} {
  func.func @frame_pooling_kernel(%arg0: i32, %arg1: memref<1x4x256xf32, #tpu.memory_space<vmem>>, %arg2: memref<32x4xf32, #tpu.memory_space<vmem>>, %arg3: memref<32x1xf32, #tpu.memory_space<vmem>>, %arg4: memref<8x32xf32, #tpu.memory_space<vmem>>, %arg5: memref<8x1xf32, #tpu.memory_space<vmem>>, %arg6: memref<4x8xf32, #tpu.memory_space<vmem>>, %arg7: memref<1x4x256xf32, #tpu.memory_space<vmem>>) attributes {dimension_semantics = [#tpu.dimension_semantics<parallel>], iteration_bounds = array<i64: 2>, scalar_prefetch = 0 : i64, scratch_operands = 0 : i64, tpu.core_type = #tpu.core_type<tc>, window_params = [{transform_indices = @transform_0, window_bounds = array<i64: 1, 4, 256>}, {pipeline_mode = #tpu.pipeline_mode<synchronous>, transform_indices = @transform_1, window_bounds = array<i64: 32, 4>}, {pipeline_mode = #tpu.pipeline_mode<synchronous>, transform_indices = @transform_2, window_bounds = array<i64: 32, 1>}, {pipeline_mode = #tpu.pipeline_mode<synchronous>, transform_indices = @transform_3, window_bounds = array<i64: 8, 32>}, {pipeline_mode = #tpu.pipeline_mode<synchronous>, transform_indices = @transform_4, window_bounds = array<i64: 8, 1>}, {pipeline_mode = #tpu.pipeline_mode<synchronous>, transform_indices = @transform_5, window_bounds = array<i64: 4, 8>}, {transform_indices = @transform_6, window_bounds = array<i64: 1, 4, 256>}]} {
    %c0 = arith.constant 0 : index
    %c0_0 = arith.constant 0 : index
    %c0_1 = arith.constant 0 : index
    %0 = vector.load %arg1[%c0, %c0_0, %c0_1] : memref<1x4x256xf32, #tpu.memory_space<vmem>>, vector<1x4x256xf32>
    %1 = vector.shape_cast %0 : vector<1x4x256xf32> to vector<4x256xf32>
    %cst = arith.constant dense<0.000000e+00> : vector<4xf32>
    %2 = vector.multi_reduction <add>, %1, %cst [1] : vector<4x256xf32> to vector<4xf32>
    %3 = vector.shape_cast %2 : vector<4xf32> to vector<4x1xf32>
    %cst_2 = arith.constant 3.906250e-03 : f32
    %4 = vector.broadcast %cst_2 : f32 to vector<4x1xf32>
    %5 = arith.mulf %3, %4 : vector<4x1xf32>
    %c0_3 = arith.constant 0 : index
    %c0_4 = arith.constant 0 : index
    %6 = vector.load %arg2[%c0_3, %c0_4] : memref<32x4xf32, #tpu.memory_space<vmem>>, vector<32x4xf32>
    %cst_5 = arith.constant dense<0.000000e+00> : vector<32x1xf32>
    %7 = tpu.matmul %6, %5, %cst_5 {dimension_numbers = #tpu.dot_dimension_numbers<[1], [0], [0], [1], [0, 0, 1, 1], [], []>} : vector<32x4xf32>, vector<4x1xf32>, vector<32x1xf32> -> vector<32x1xf32>
    %c0_6 = arith.constant 0 : index
    %c0_7 = arith.constant 0 : index
    %8 = vector.load %arg3[%c0_6, %c0_7] : memref<32x1xf32, #tpu.memory_space<vmem>>, vector<32x1xf32>
    %9 = arith.addf %7, %8 : vector<32x1xf32>
    %cst_8 = arith.constant 0.000000e+00 : f32
    %10 = vector.broadcast %cst_8 : f32 to vector<32x1xf32>
    %11 = arith.maximumf %9, %10 : vector<32x1xf32>
    %c0_9 = arith.constant 0 : index
    %c0_10 = arith.constant 0 : index
    %12 = vector.load %arg4[%c0_9, %c0_10] : memref<8x32xf32, #tpu.memory_space<vmem>>, vector<8x32xf32>
    %cst_11 = arith.constant dense<0.000000e+00> : vector<8x1xf32>
    %13 = tpu.matmul %12, %11, %cst_11 {dimension_numbers = #tpu.dot_dimension_numbers<[1], [0], [0], [1], [0, 0, 1, 1], [], []>} : vector<8x32xf32>, vector<32x1xf32>, vector<8x1xf32> -> vector<8x1xf32>
    %c0_12 = arith.constant 0 : index
    %c0_13 = arith.constant 0 : index
    %14 = vector.load %arg5[%c0_12, %c0_13] : memref<8x1xf32, #tpu.memory_space<vmem>>, vector<8x1xf32>
    %15 = arith.addf %13, %14 : vector<8x1xf32>
    %16 = arith.negf %15 : vector<8x1xf32>
    %17 = math.exp %16 : vector<8x1xf32>
    %cst_14 = arith.constant 1.000000e+00 : f32
    %18 = vector.broadcast %cst_14 : f32 to vector<8x1xf32>
    %19 = arith.addf %18, %17 : vector<8x1xf32>
    %20 = arith.divf %18, %19 : vector<8x1xf32>
    %c0_15 = arith.constant 0 : index
    %c0_16 = arith.constant 0 : index
    %21 = vector.load %arg6[%c0_15, %c0_16] : memref<4x8xf32, #tpu.memory_space<vmem>>, vector<4x8xf32>
    %cst_17 = arith.constant dense<0.000000e+00> : vector<4x1xf32>
    %22 = tpu.matmul %21, %20, %cst_17 {dimension_numbers = #tpu.dot_dimension_numbers<[1], [0], [0], [1], [0, 0, 1, 1], [], []>} : vector<4x8xf32>, vector<8x1xf32>, vector<4x1xf32> -> vector<4x1xf32>
    %c0_18 = arith.constant 0 : index
    %c0_19 = arith.constant 0 : index
    %c0_20 = arith.constant 0 : index
    %23 = vector.load %arg1[%c0_18, %c0_19, %c0_20] : memref<1x4x256xf32, #tpu.memory_space<vmem>>, vector<1x4x256xf32>
    %24 = vector.shape_cast %23 : vector<1x4x256xf32> to vector<4x256xf32>
    %25 = vector.broadcast %22 : vector<4x1xf32> to vector<4x256xf32>
    %26 = arith.mulf %24, %25 : vector<4x256xf32>
    %c0_21 = arith.constant 0 : index
    %c0_22 = arith.constant 0 : index
    %c0_23 = arith.constant 0 : index
    %27 = vector.load %arg7[%c0_21, %c0_22, %c0_23] : memref<1x4x256xf32, #tpu.memory_space<vmem>>, vector<1x4x256xf32>
    %28 = vector.shape_cast %27 : vector<1x4x256xf32> to vector<4x256xf32>
    %29 = vector.shape_cast %26 : vector<4x256xf32> to vector<1x4x256xf32>
    tpu.vector_store %arg7[%c0_21, %c0_22, %c0_23], %29 {strides = array<i32>} : memref<1x4x256xf32, #tpu.memory_space<vmem>>, vector<1x4x256xf32>,
    return
  }
  func.func @transform_0(%arg0: i32) -> (i32, i32, i32) {
    %c0_i32 = arith.constant 0 : i32
    %c0_i32_0 = arith.constant 0 : i32
    %c0_i32_1 = arith.constant 0 : i32
    return %arg0, %c0_i32, %c0_i32_0 : i32, i32, i32
  }
  func.func @transform_1(%arg0: i32) -> (i32, i32) {
    %c0_i32 = arith.constant 0 : i32
    %c0_i32_0 = arith.constant 0 : i32
    %c0_i32_1 = arith.constant 0 : i32
    return %c0_i32, %c0_i32_0 : i32, i32
  }
  func.func @transform_2(%arg0: i32) -> (i32, i32) {
    %c0_i32 = arith.constant 0 : i32
    %c0_i32_0 = arith.constant 0 : i32
    %c0_i32_1 = arith.constant 0 : i32
    return %c0_i32, %c0_i32_0 : i32, i32
  }
  func.func @transform_3(%arg0: i32) -> (i32, i32) {
    %c0_i32 = arith.constant 0 : i32
    %c0_i32_0 = arith.constant 0 : i32
    %c0_i32_1 = arith.constant 0 : i32
    return %c0_i32, %c0_i32_0 : i32, i32
  }
  func.func @transform_4(%arg0: i32) -> (i32, i32) {
    %c0_i32 = arith.constant 0 : i32
    %c0_i32_0 = arith.constant 0 : i32
    %c0_i32_1 = arith.constant 0 : i32
    return %c0_i32, %c0_i32_0 : i32, i32
  }
  func.func @transform_5(%arg0: i32) -> (i32, i32) {
    %c0_i32 = arith.constant 0 : i32
    %c0_i32_0 = arith.constant 0 : i32
    %c0_i32_1 = arith.constant 0 : i32
    return %c0_i32, %c0_i32_0 : i32, i32
  }
  func.func @transform_6(%arg0: i32) -> (i32, i32, i32) {
    %c0_i32 = arith.constant 0 : i32
    %c0_i32_0 = arith.constant 0 : i32
    %c0_i32_1 = arith.constant 0 : i32
    return %arg0, %c0_i32, %c0_i32_0 : i32, i32, i32
  }
}

</mosaic_0001>

<bundles_post_ra>
// kernel: frame_pooling.1
= control target key start
LH: loop header
LB: loop body
LE: loop exit
PB: predicated region body
PF: predicated region fallthrough
CT: control target
= control target key end

     0   :  { %s732_s21 = smov 0   ;;  %s799_s0 = inlined_call_operand.vmem [shape: f32[2,4,256], index: 0, kind: input, shape index: {}, may-alias: {0,6}]   ;;  %s800_s1 = inlined_call_operand.vmem [shape: f32[32,4], index: 1, kind: input, shape index: {}]   ;;  %s801_s2 = inlined_call_operand.vmem [shape: f32[32,1], index: 2, kind: input, shape index: {}]   ;;  %s802_s3 = inlined_call_operand.vmem [shape: f32[8,32], index: 3, kind: input, shape index: {}]   ;;  %s803_s4 = inlined_call_operand.vmem [shape: f32[8,1], index: 4, kind: input, shape index: {}]   ;;  %s804_s5 = inlined_call_operand.vmem [shape: f32[4,8], index: 5, kind: input, shape index: {}]   ;;  %s805_s6 = inlined_call_operand.vmem [shape: f32[2,4,256], index: 6, kind: output, shape index: {}, may-alias: {0,6}]  }
   0x1 LB: > { %s602_s22 = sadd.s32 4294967295, %s690_s21   ;;  %p606_p0 = scmp.ge.s32.totalorder %s690_s21, 1  ;;  %s690_s21 = sphi %s732_s21, %s16_s21  }
   0x2   : > { %p212_p1 = scmp.lt.s32.totalorder %s690_s21, 3 }
   0x4   : > { %p213_p2 = pnand %p606_p0, %p212_p1 }
   0x5   : > { %p242_p3 = scmp.lt.s32.totalorder (!%p213_p2), %s602_s22, 1  ;;  %vm256_vm0 = vcmask (!%p213_p2), 1043456   ;;  %v263_v5 = vld [vmem:[%s800_s1] sm:$0xff] (!%p213_p2)  ;;  %vm271_vm1 = vcmask (!%p213_p2), 31744   ;;  %v264_v8 = vld [vmem:[%s800_s1 + $0x8] sm:$0xff] (!%p213_p2)  ;;  %v265_v9 = vld [vmem:[%s800_s1 + $0x10] sm:$0xff] (!%p213_p2)  ;;  %v540_v46 = vlaneseq (!%p213_p2) }
   0x6   : > { %216 = sbr.rel (%p213_p2) target bundleno = 980 (0x3d4), region = 44  ;;  %637 = vmatprep.mubr.msk.f32.mxu0 (!%p213_p2), %vm271_vm1, %v263_v5  ;;  %v266_v10 = vld [vmem:[%s800_s1 + $0x18] sm:$0xff] (!%p213_p2)  ;;  %v692_v11 = vmov (!%p213_p2), 0.0|0.0   ;;  %vm693_vm2 = vmmov (!%p213_p2), 0   ;;  %v694_v12 = vmov (!%p213_p2), 0.0   ;;  %v268_v13 = vld [vmem:[%s801_s2 + $0x8] sm:$0xff] (!%p213_p2) }
   0x7   : > { %659 = vmatprep.subr.bf16.mxu1 (!%p213_p2), %v692_v11  ;;  %651 = vmatprep.mubr.msk.f32.mxu1 (!%p213_p2), %vm693_vm2, %v694_v12  ;;  %v267_v14 = vld [vmem:[%s801_s2] sm:$0xff] (!%p213_p2)  ;;  %v270_v19 = vld [vmem:[%s801_s2 + $0x18] sm:$0xff] (!%p213_p2)  ;;  %v269_v21 = vld [vmem:[%s801_s2 + $0x10] sm:$0xff] (!%p213_p2)  ;;  %vm378_vm3 = vcmask (!%p213_p2), 261120   ;;  %vm459_vm4 = vcmask (!%p213_p2), 64512   ;;  %v695_v41 = vmov (!%p213_p2), 0  }
   0x8   : > { %v376_v31 = vld [vmem:[%s802_s3] sm:$0xff] (!%p213_p2)  ;;  %678 = vset.pattern.permute.xlu0 (!%p213_p2), %v695_v41  ;;  %v696_v44 = vmov (!%p213_p2), 839922192   ;;  %v541_v48 = vshrl.u32 (!%p213_p2), %v540_v46, 7 }
   0x9   : > { %v377_v32 = vld [vmem:[%s803_s4] sm:$0xff] (!%p213_p2)  ;;  %v538_v45 = vunpack.c.l.s4 (!%p213_p2), %v696_v44 }
   0xa   : > { %v458_v39 = vld [vmem:[%s804_s5] sm:$0xf] (!%p213_p2) }
   0xb   : > { %v539_v47 = vunpack.c.0.s8 (!%p213_p2), %v538_v45 }
   0xd   : > { %s807_s22 = smov (!%p242_p3, %s602_s22), 1  ;;  %v542_v49 = vsub.s32 %v539_v47, %v541_v48 }
   0xe   : > { %s621_s23 = sshll.u32 %s807_s22, 3 }
   0xf   : > { %s246_s26 = scalar_lea.vmem %s799_s0, %s621_s23  ;;  %s251_s30 = scalar_lea.vmem %s805_s6, %s621_s23 }
  0x10   : > { %v748_v0 = vld [vmem:[%s246_s26] sm:$0xff] }
  0x11   : > { %v254_v1 = vcombine.high %v748_v0, %v748_v0  ;;  %v257_v2 = vsel %vm256_vm0, %v748_v0, 0.0 }
  0x13   : > { %v258_v3 = vsel %vm256_vm0, %v254_v1, 0.0 }
  0x14   : > { %v259_v4 = vadd.f32 %v258_v3, %v257_v2 }
  0x16   : > { %260 = vadd.xlane.f32.xlu0 %v259_v4 }
  0xa3   : > { %v261_v6 = vpop.xlane.xlu0 %260 }
  0xa4   : > { %v262_v7 = vmul.f32 0.00390625, %v261_v6 }
  0xa6   : > { %635 = vmatprep.subr.msk.mxu0 %vm256_vm0, %v262_v7 }
  0xa7   : > { %636 = vmatpush3.msk.msra.mxu0 %vm256_vm0, %v262_v7 }
  0xa8   : > { %638 = vmatmul.mubr.msk.f32.vlgmr.msra.gmra.mrb[0].mxu0 %vm271_vm1, %v264_v8  ;;  %654 = vmatprep.subr.mxu0 %v694_v12 }
  0xa9   : > { %640 = vmatprep.mubr.msk.f32.mxu0 %vm271_vm1, %v265_v9 }
  0xac   : > { %641 = vmatmul.mubr.msk.f32.gmra.mrb[2].mxu0 %vm271_vm1, %v266_v10 }
  0xad   : > { %656 = vmatprep.mubr.msk.f32.mxu0 %vm693_vm2, %v694_v12 }
 0x17b   : > { %v639_v15 = vpop.f32.mrb[0].mxu0 }
 0x17c   : > { %v359_v16 = vadd.f32 %v639_v15, %v268_v13  ;;  %v353_v17 = vpop.f32.mrb[1].mxu0 }
 0x17d   : > { %v354_v18 = vadd.f32 %v353_v17, %v267_v14 }
 0x17e   : > { %v373_v20 = vmax.f32 %v359_v16, 0.0 }
 0x17f   : > { %v372_v22 = vmax.f32 %v354_v18, 0.0  ;;  %v642_v23 = vpop.f32.mrb[2].mxu0 }
 0x180   : > { %v369_v24 = vadd.f32 %v642_v23, %v270_v19  ;;  %v363_v25 = vpop.f32.mrb[3].mxu0 }
 0x181   : > { %v364_v26 = vadd.f32 %v363_v25, %v269_v21  ;;  %v660_v27 = vpack.c.bf16 %v373_v20, %v372_v22 }
 0x182   : > { %v375_v28 = vmax.f32 %v369_v24, 0.0 }
 0x183   : > { %v374_v29 = vmax.f32 %v364_v26, 0.0  ;;  %661 = vmatpush3.bf16.msra.mxu1 %v660_v27 }
 0x184   : > { %662 = vmatprep.subr.bf16.mxu1 %v692_v11 }
 0x185   : > { %v663_v30 = vpack.c.bf16 %v375_v28, %v374_v29 }
 0x187   : > { %664 = vmatpush3.bf16.msra.mxu1 %v663_v30 }
 0x18a   : > { %652 = vmatmul.mubr.msk.f32.vlgmr.msra.gmra.mrb[0].mxu1 %vm378_vm3, %v376_v31 }
 0x25d   : > { %v448_v33 = vpop.f32.mrb[0].mxu1 }
 0x25e   : > { %v449_v34 = vadd.f32 %v448_v33, %v377_v32  ;;  %v653_v35 = vpop.f32.mrb[1].mxu1 }
 0x260   : > { %v617_v36 = vmul.f32 -1.442695, %v449_v34 }
 0x262   : > { %680 = vpow2.f32 %v617_v36 }
 0x26c   : > { %v681_v37 = vpop.eup %680 }
 0x26d   : > { %v455_v38 = vadd.f32 1.0, %v681_v37 }
 0x26f   : > { %682 = vrcp.f32 %v455_v38 }
 0x279   : > { %v683_v40 = vpop.eup %682 }
 0x27a   : > { %655 = vmatpush3.msra.mxu0 %v683_v40 }
 0x27b   : > { %657 = vmatmul.mubr.msk.f32.vlgmr.msra.gmra.mrb[4].mxu0 %vm459_vm4, %v458_v39 }
 0x34e   : > { %v529_v42 = vpop.f32.mrb[4].mxu0 }
 0x34f   : > { %v658_v43 = vpop.f32.mrb[5].mxu0  ;;  %535 = vperm.xlu0 %678, %v529_v42  }
 0x3ce   : > { %v536_v50 = vpop.permute.xlu0 %535 }
 0x3cf   : > { %v543_v51 = vrot.slane %v536_v50, %v542_v49 }
 0x3d1   : > { %v545_v52 = vmul.f32 %v543_v51, %v748_v0 }
 0x3d3   : > { %546 = vst [vmem:[%s251_s30] sm:$0xff] %v545_v52 }
 0x3d4 PF: > { %s16_s21 = sadd.s32 1, %s690_s21  }
 0x3d5   : > { %p13_p4 = scmp.ge.s32.totalorder %s16_s21, 4  }
 0x3d7   :  { %15 = sbr.rel (!%p13_p4) target bundleno = 1 (0x1), region = 74 }

</bundles_post_ra>
